<compile_context>
chip_gen: v6e
topology: v6e:2x2x1
jax: 0.10.0
libtpu: 0.0.40
codegen_flags: <defaults>
</compile_context>

<pallas_src>
import functools

import jax
import jax.numpy as jnp
from jax.experimental import pallas as pl
from jax.experimental.pallas import tpu as pltpu


# ----------------------------------------------------------------------------
# In-kernel helpers
# ----------------------------------------------------------------------------
def _pool_and_norm(band_ref, x_ref, gamma_ref, eps, tokens_per_side):
    """Band-structured average pooling + Gemma RMSNorm -> (T*T, V) float32."""
    T = tokens_per_side
    kP = band_ref.shape[1]
    _, V = x_ref.shape
    # Split patch rows into T row-bands (leading-dim split: layout no-op).
    x_bands = x_ref[...].reshape(T, kP, V)                         # (T, k*P, V)
    band = jnp.broadcast_to(band_ref[...][None, :, :], (T, T, kP))  # tiny
    # Batched MXU matmul over row-bands: K = k*P (T x fewer FLOPs than the
    # dense one-hot pooling matmul), native dtype in, f32 accumulation.
    pooled = jax.lax.dot_general(
        band, x_bands,
        dimension_numbers=(((2,), (1,)), ((0,), (0,))),
        preferred_element_type=jnp.float32)                        # (T, T, V)
    pooled = pooled.reshape(T * T, V)
    # Gemma RMSNorm in f32 (as in Gemma2RMSNorm).
    var = jnp.mean(pooled * pooled, axis=-1, keepdims=True)
    normed = pooled * jax.lax.rsqrt(var + eps)
    return normed * (1.0 + gamma_ref[...].astype(jnp.float32))     # (T*T, V) f32


def _projector_kernel_full(band_ref, x_ref, gamma_ref, w_ref, o_ref, *,
                           eps, tokens_per_side):
    # band_ref : (T, k*P)  per-band averaging matrix (activation dtype)
    # x_ref    : (P*P, V)  one batch element (batch dim squeezed)
    # gamma_ref: (1, V)    RMSNorm weight
    # w_ref    : (V, H)    full projection weight -- its block index never
    #                      changes, so Pallas DMAs it exactly once (resident)
    # o_ref    : (T*T, H)  full, lane-dense output tile (batch dim squeezed)
    normed = _pool_and_norm(band_ref, x_ref, gamma_ref, eps, tokens_per_side)
    normed = normed.astype(x_ref.dtype)   # match PyTorch: cast before matmul
    o_ref[...] = jnp.dot(normed, w_ref[...],
                         preferred_element_type=jnp.float32).astype(o_ref.dtype)


def _projector_kernel_tiled(band_ref, x_ref, gamma_ref, w_ref, o_ref,
                            normed_ref, *, eps, tokens_per_side):
    # Fallback layout for VMEM-tight configs (e.g. v7x 64 MiB + largest H):
    # grid = (B, H/tn).  Pool + norm run once per batch element (j == 0) and
    # the result is carried across the H axis in normed_ref.
    # NOTE: the H axis MUST stay "arbitrary" (and batch must remain the outer
    # grid axis) -- the scratch carry is only re-initialised at j == 0.
    j = pl.program_id(1)

    @pl.when(j == 0)
    def _():
        normed = _pool_and_norm(band_ref, x_ref, gamma_ref, eps, tokens_per_side)
        normed_ref[...] = normed.astype(normed_ref.dtype)

    o_ref[...] = jnp.dot(normed_ref[...], w_ref[...],
                         preferred_element_type=jnp.float32).astype(o_ref.dtype)


# ----------------------------------------------------------------------------
# Host-side helpers
# ----------------------------------------------------------------------------
def make_band_matrix(patches_per_image, tokens_per_side, dtype=jnp.float32):
    """(T, k*P) averaging matrix for one row-band of patches.

    band[tc, r] = 1/k^2 iff the within-band flat index r (= row_in_band * P +
    col) satisfies col // k == tc.  The same matrix applies to every row-band.
    """
    P, T = patches_per_image, tokens_per_side
    k = P // T
    kP = k * P
    col = jnp.arange(kP) % P
    onehot = (col // k)[None, :] == jnp.arange(T)[:, None]
    return (onehot.astype(jnp.float32) / float(k * k)).astype(dtype)


def _vmem_capacity_bytes():
    try:
        cap = getattr(pltpu.get_tpu_info(), "vmem_capacity_bytes", None)
        if cap:
            return int(cap)
    except Exception:
        pass
    return 64 << 20  # conservative fallback: v7x per-core VMEM


def _pick_h_tile(H, est_fn, budget):
    """Largest H tile dividing H that fits the budget; prefer 256-multiples
    (v6e/v7x MXU is 256 wide), then 128-multiples, else the whole H."""
    for align in (256, 128):
        best = None
        tn = align
        while tn <= H:
            if H % tn == 0 and est_fn(tn) <= budget:
                best = tn
            tn += align
        if best is not None:
            return best
    return H


# ----------------------------------------------------------------------------
# Public wrapper
# ----------------------------------------------------------------------------
def gemma3_mm_projector(vision_outputs, norm_weight, proj_weight, *,
                        patches_per_image, tokens_per_side,
                        eps=1e-6, tn=None, compute_dtype=None):
    """Gemma3 multi-modal projector forward.

    vision_outputs: (B, P*P, V); norm_weight: (V,) or (1, V);
    proj_weight: (V, H).  Returns (B, T*T, H) in vision_outputs.dtype.
    compute_dtype: optionally cast activations/weights (e.g. jnp.bfloat16)
    before the kernel; result is cast back to the input dtype.
    """
    orig_dtype = vision_outputs.dtype
    if compute_dtype is not None:
        vision_outputs = vision_outputs.astype(compute_dtype)
        proj_weight = proj_weight.astype(compute_dtype)
        norm_weight = norm_weight.astype(compute_dtype)

    B, P2, V = vision_outputs.shape
    P, T = patches_per_image, tokens_per_side
    assert P2 == P * P, "seq_length must equal patches_per_image**2"
    assert P % T == 0, "patches_per_image must be divisible by tokens_per_side"
    k = P // T
    kP = k * P
    T2 = T * T
    Vw, H = proj_weight.shape
    assert Vw == V

    act_dtype = vision_outputs.dtype
    itemsize = jnp.dtype(act_dtype).itemsize
    norm_weight = jnp.reshape(norm_weight, (1, V)).astype(act_dtype)
    band = make_band_matrix(P, T, dtype=act_dtype)

    # --- per-chip VMEM budget ------------------------------------------------
    cap = _vmem_capacity_bytes()
    budget = int(0.80 * cap)
    f32_tmp = (T * T * kP + 3 * T2 * V) * 4          # broadcast band + f32 temps

    def est_tiled(tile):
        return (2 * (P2 * V + T2 * tile + V * tile) * itemsize   # pipelined blocks
                + (T * kP + V) * itemsize                        # small invariants
                + T2 * V * itemsize                              # normed scratch
                + f32_tmp)

    est_full = (2 * (P2 * V + T2 * H) * itemsize                 # pipelined x / out
                + 2 * V * H * itemsize                           # resident W (x2 conservative)
                + (T * kP + V) * itemsize
                + f32_tmp)

    if tn is None:
        tn = H if est_full <= budget else _pick_h_tile(H, est_tiled, budget)
    assert H % tn == 0, "H tile must divide the text hidden size"
    full_h = (tn == H)

    est = est_full if full_h else est_tiled(tn)
    vmem_limit = int(min(0.92 * cap, max(32 << 20, 1.25 * est)))

    # --- cost estimate (weight counted once when resident, B times if tiled) -
    w_reads = 1 if full_h else B
    cost = pl.CostEstimate(
        flops=2 * B * (T2 * kP * V + T2 * V * H),
        transcendentals=B * T2,
        bytes_accessed=(B * P2 * V + B * T2 * H + w_reads * V * H
                        + T * kP + V) * itemsize)

    if full_h:
        kernel = functools.partial(_projector_kernel_full,
                                   eps=eps, tokens_per_side=T)
        grid_spec = pltpu.PrefetchScalarGridSpec(
            num_scalar_prefetch=0,
            grid=(B,),
            in_specs=[
                pl.BlockSpec((T, kP), lambda b: (0, 0)),          # band matrix
                pl.BlockSpec((None, P2, V), lambda b: (b, 0, 0)),  # x (squeezed)
                pl.BlockSpec((1, V), lambda b: (0, 0)),            # gamma
                pl.BlockSpec((V, H), lambda b: (0, 0)),            # resident W
            ],
            out_specs=pl.BlockSpec((None, T2, H), lambda b: (b, 0, 0)),
            scratch_shapes=[],
        )
        dim_sem = ("parallel",)
    else:
        kernel = functools.partial(_projector_kernel_tiled,
                                   eps=eps, tokens_per_side=T)
        n_h = H // tn
        grid_spec = pltpu.PrefetchScalarGridSpec(
            num_scalar_prefetch=0,
            grid=(B, n_h),
            in_specs=[
                pl.BlockSpec((T, kP), lambda b, j: (0, 0)),
                pl.BlockSpec((None, P2, V), lambda b, j: (b, 0, 0)),
                pl.BlockSpec((1, V), lambda b, j: (0, 0)),
                pl.BlockSpec((V, tn), lambda b, j: (0, j)),        # streamed W tile
            ],
            out_specs=pl.BlockSpec((None, T2, tn), lambda b, j: (b, 0, j)),
            scratch_shapes=[pltpu.VMEM((T2, V), act_dtype)],
        )
        # H axis carries the normed scratch across tiles -> must be "arbitrary".
        dim_sem = ("parallel", "arbitrary")

    out = pl.pallas_call(
        kernel,
        out_shape=jax.ShapeDtypeStruct((B, T2, H), act_dtype),
        grid_spec=grid_spec,
        compiler_params=pltpu.CompilerParams(
            dimension_semantics=dim_sem,
            vmem_limit_bytes=vmem_limit),
        cost_estimate=cost,
    )(band, vision_outputs, norm_weight, proj_weight)

    if out.dtype != orig_dtype:
        out = out.astype(orig_dtype)
    return out


# ----------------------------------------------------------------------------
# Pure-JAX reference (mirrors the PyTorch forward, NCHW avg-pool path)
# ----------------------------------------------------------------------------
def reference_forward(vision_outputs, norm_weight, proj_weight,
                      patches_per_image, tokens_per_side, eps=1e-6):
    B, N, C = vision_outputs.shape
    P, T = patches_per_image, tokens_per_side
    k = P // T
    x = jnp.transpose(vision_outputs, (0, 2, 1)).reshape(B, C, P, P)     # NCHW
    x = x.reshape(B, C, T, k, T, k).mean(axis=(3, 5))                    # avg pool
    x = x.reshape(B, C, T * T)
    x = jnp.transpose(x, (0, 2, 1))                                      # (B, T*T, C)
    xf = x.astype(jnp.float32)
    var = jnp.mean(xf * xf, axis=-1, keepdims=True)
    normed = xf * jax.lax.rsqrt(var + eps) * (1.0 + norm_weight.astype(jnp.float32))
    normed = normed.astype(x.dtype)
    out = jnp.matmul(normed, proj_weight)
    return out.astype(vision_outputs.dtype)


if __name__ == "__main__":
    # Small synthetic config consistent with the module:
    #   vision_hidden V=128, text_hidden H=256, patches_per_image P=32,
    #   mm_tokens_per_image = 64 -> tokens_per_side T=8, avg-pool kernel k=4.
    B, V, H = 2, 128, 256
    P, T = 32, 8
    eps = 1e-6

    key = jax.random.PRNGKey(0)
    k1, k2, k3 = jax.random.split(key, 3)
    vision_outputs = jax.random.normal(k1, (B, P * P, V), dtype=jnp.float32)
    # The module inits the projection weight to zeros; use random values so
    # the computation is non-trivial.
    proj_weight = jax.random.normal(k2, (V, H), dtype=jnp.float32) * 0.02
    norm_weight = jax.random.normal(k3, (V,), dtype=jnp.float32) * 0.1

    ref = reference_forward(vision_outputs, norm_weight, proj_weight, P, T, eps)

    # 1) f32, default layout: projection weight fully VMEM-resident, grid=(B,).
    out = gemma3_mm_projector(vision_outputs, norm_weight, proj_weight,
                              patches_per_image=P, tokens_per_side=T, eps=eps)
    out = jax.block_until_ready(out)
    assert out.shape == (B, T * T, H)
    assert jnp.allclose(out, ref, rtol=2e-2, atol=2e-2), "f32 resident-W mismatch"

    # 2) f32, forced H tiling: exercises the scratch-carry fallback path used
    #    when the resident-weight layout would not fit VMEM (e.g. v7x, big H).
    out_t = gemma3_mm_projector(vision_outputs, norm_weight, proj_weight,
                                patches_per_image=P, tokens_per_side=T,
                                eps=eps, tn=128)
    out_t = jax.block_until_ready(out_t)
    assert out_t.shape == (B, T * T, H)
    assert jnp.allclose(out_t, ref, rtol=2e-2, atol=2e-2), "f32 tiled mismatch"

    # 3) bf16 compute path (real Gemma3 dtype): wrapper casts f32 inputs to
    #    bf16, kernel runs bf16-in / f32-accumulate, result cast back to f32.
    out_bf16 = gemma3_mm_projector(vision_outputs, norm_weight, proj_weight,
                                   patches_per_image=P, tokens_per_side=T,
                                   eps=eps, compute_dtype=jnp.bfloat16)
    out_bf16 = jax.block_until_ready(out_bf16)
    assert out_bf16.shape == (B, T * T, H)
    assert out_bf16.dtype == vision_outputs.dtype
    assert jnp.allclose(out_bf16, ref, rtol=5e-2, atol=5e-2), "bf16 mismatch"

    print("KERNEL_OK")
</pallas_src>

<mosaic_0001>
module attributes {stable_mosaic.version = 11 : i64} {
  func.func @_projector_kernel_full(%arg0: i32, %arg1: memref<8x128xf32, #tpu.memory_space<vmem>>, %arg2: memref<1x1024x128xf32, #tpu.memory_space<vmem>>, %arg3: memref<1x128xf32, #tpu.memory_space<vmem>>, %arg4: memref<128x256xf32, #tpu.memory_space<vmem>>, %arg5: memref<1x64x256xf32, #tpu.memory_space<vmem>>) attributes {dimension_semantics = [#tpu.dimension_semantics<parallel>], iteration_bounds = array<i64: 2>, scalar_prefetch = 0 : i64, scratch_operands = 0 : i64, tpu.core_type = #tpu.core_type<tc>, window_params = [{pipeline_mode = #tpu.pipeline_mode<synchronous>, transform_indices = @transform_0, window_bounds = array<i64: 8, 128>}, {transform_indices = @transform_1, window_bounds = array<i64: 1, 1024, 128>}, {pipeline_mode = #tpu.pipeline_mode<synchronous>, transform_indices = @transform_2, window_bounds = array<i64: 1, 128>}, {pipeline_mode = #tpu.pipeline_mode<synchronous>, transform_indices = @transform_3, window_bounds = array<i64: 128, 256>}, {transform_indices = @transform_4, window_bounds = array<i64: 1, 64, 256>}]} {
    %c0 = arith.constant 0 : index
    %c0_0 = arith.constant 0 : index
    %c0_1 = arith.constant 0 : index
    %0 = vector.load %arg2[%c0, %c0_0, %c0_1] : memref<1x1024x128xf32, #tpu.memory_space<vmem>>, vector<1x1024x128xf32>
    %1 = vector.shape_cast %0 : vector<1x1024x128xf32> to vector<1024x128xf32>
    %2 = vector.shape_cast %1 : vector<1024x128xf32> to vector<8x128x128xf32>
    %c0_2 = arith.constant 0 : index
    %c0_3 = arith.constant 0 : index
    %3 = vector.load %arg1[%c0_2, %c0_3] : memref<8x128xf32, #tpu.memory_space<vmem>>, vector<8x128xf32>
    %4 = vector.shape_cast %3 : vector<8x128xf32> to vector<1x8x128xf32>
    %5 = vector.shape_cast %4 : vector<1x8x128xf32> to vector<1x8x128xf32>
    %6 = vector.broadcast %5 : vector<1x8x128xf32> to vector<8x8x128xf32>
    %cst = arith.constant dense<0.000000e+00> : vector<8x8x128xf32>
    %7 = tpu.matmul %6, %2, %cst {dimension_numbers = #tpu.dot_dimension_numbers<[2], [1], [1], [2], [0, 0, 0, 1, 1, 2], [0], [0]>} : vector<8x8x128xf32>, vector<8x128x128xf32>, vector<8x8x128xf32> -> vector<8x8x128xf32>
    %8 = vector.shape_cast %7 : vector<8x8x128xf32> to vector<64x128xf32>
    %9 = arith.mulf %8, %8 : vector<64x128xf32>
    %cst_4 = arith.constant dense<0.000000e+00> : vector<64xf32>
    %10 = vector.multi_reduction <add>, %9, %cst_4 [1] : vector<64x128xf32> to vector<64xf32>
    %11 = vector.shape_cast %10 : vector<64xf32> to vector<64x1xf32>
    %cst_5 = arith.constant 1.280000e+02 : f32
    %12 = vector.broadcast %cst_5 : f32 to vector<64x1xf32>
    %13 = arith.divf %11, %12 : vector<64x1xf32>
    %cst_6 = arith.constant 9.99999997E-7 : f32
    %14 = vector.broadcast %cst_6 : f32 to vector<64x1xf32>
    %15 = arith.addf %13, %14 : vector<64x1xf32>
    %16 = math.rsqrt %15 : vector<64x1xf32>
    %17 = vector.broadcast %16 : vector<64x1xf32> to vector<64x128xf32>
    %18 = arith.mulf %8, %17 : vector<64x128xf32>
    %c0_7 = arith.constant 0 : index
    %c0_8 = arith.constant 0 : index
    %19 = vector.load %arg3[%c0_7, %c0_8] : memref<1x128xf32, #tpu.memory_space<vmem>>, vector<1x128xf32>
    %cst_9 = arith.constant 1.000000e+00 : f32
    %20 = vector.broadcast %cst_9 : f32 to vector<1x128xf32>
    %21 = arith.addf %20, %19 : vector<1x128xf32>
    %22 = vector.broadcast %21 : vector<1x128xf32> to vector<64x128xf32>
    %23 = arith.mulf %18, %22 : vector<64x128xf32>
    %c0_10 = arith.constant 0 : index
    %c0_11 = arith.constant 0 : index
    %24 = vector.load %arg4[%c0_10, %c0_11] : memref<128x256xf32, #tpu.memory_space<vmem>>, vector<128x256xf32>
    %cst_12 = arith.constant dense<0.000000e+00> : vector<64x256xf32>
    %25 = tpu.matmul %23, %24, %cst_12 {dimension_numbers = #tpu.dot_dimension_numbers<[1], [0], [0], [1], [0, 0, 1, 1], [], []>} : vector<64x128xf32>, vector<128x256xf32>, vector<64x256xf32> -> vector<64x256xf32>
    %c0_13 = arith.constant 0 : index
    %c0_14 = arith.constant 0 : index
    %c0_15 = arith.constant 0 : index
    %26 = vector.load %arg5[%c0_13, %c0_14, %c0_15] : memref<1x64x256xf32, #tpu.memory_space<vmem>>, vector<1x64x256xf32>
    %27 = vector.shape_cast %26 : vector<1x64x256xf32> to vector<64x256xf32>
    %28 = vector.shape_cast %25 : vector<64x256xf32> to vector<1x64x256xf32>
    tpu.vector_store %arg5[%c0_13, %c0_14, %c0_15], %28 {strides = array<i32>} : memref<1x64x256xf32, #tpu.memory_space<vmem>>, vector<1x64x256xf32>,
    return
  }
  func.func @transform_0(%arg0: i32) -> (i32, i32) {
    %c0_i32 = arith.constant 0 : i32
    %c0_i32_0 = arith.constant 0 : i32
    %c0_i32_1 = arith.constant 0 : i32
    return %c0_i32, %c0_i32_0 : i32, i32
  }
  func.func @transform_1(%arg0: i32) -> (i32, i32, i32) {
    %c0_i32 = arith.constant 0 : i32
    %c0_i32_0 = arith.constant 0 : i32
    %c0_i32_1 = arith.constant 0 : i32
    return %arg0, %c0_i32, %c0_i32_0 : i32, i32, i32
  }
  func.func @transform_2(%arg0: i32) -> (i32, i32) {
    %c0_i32 = arith.constant 0 : i32
    %c0_i32_0 = arith.constant 0 : i32
    %c0_i32_1 = arith.constant 0 : i32
    return %c0_i32, %c0_i32_0 : i32, i32
  }
  func.func @transform_3(%arg0: i32) -> (i32, i32) {
    %c0_i32 = arith.constant 0 : i32
    %c0_i32_0 = arith.constant 0 : i32
    %c0_i32_1 = arith.constant 0 : i32
    return %c0_i32, %c0_i32_0 : i32, i32
  }
  func.func @transform_4(%arg0: i32) -> (i32, i32, i32) {
    %c0_i32 = arith.constant 0 : i32
    %c0_i32_0 = arith.constant 0 : i32
    %c0_i32_1 = arith.constant 0 : i32
    return %arg0, %c0_i32, %c0_i32_0 : i32, i32, i32
  }
}

</mosaic_0001>

<bundles_post_ra>
// kernel: tpu_custom_call.1
= control target key start
LH: loop header
LB: loop body
LE: loop exit
PB: predicated region body
PF: predicated region fallthrough
CT: control target
= control target key end

     0   :  { %9 = vsyncpa [#allocation3], 0  ;;  %s2546_s0 = inlined_call_operand.hbm [shape: f32[8,128], index: 0, kind: input, shape index: {}]   ;;  %s2547_s1 = inlined_call_operand.hbm [shape: f32[2,1024,128], index: 1, kind: input, shape index: {}]   ;;  %s2548_s2 = inlined_call_operand.vmem [shape: f32[1,128], index: 2, kind: input, shape index: {}]   ;;  %s2549_s3 = inlined_call_operand.hbm [shape: f32[128,256], index: 3, kind: input, shape index: {}]   ;;  %s2550_s4 = inlined_call_operand.hbm [shape: f32[2,64,256], index: 4, kind: output, shape index: {}]  }
   0x1   :  { %10 = vsyncpa [#allocation6], 0 }
   0x2   :  { %12 = vsyncpa [#allocation6 + $0x1], 0 }
   0x3   :  { %13 = vsyncpa [#allocation4], 0 }
   0x4   :  { %15 = vsyncpa [#allocation4 + $0x1], 0  ;;  %s1992_s15 = smov 0   ;;  %s1994_s16 = smov 0  }
   0x5   :  { %s1996_s17 = smov 0   ;;  %s1998_s18 = smov 0  }
   0x6 LB: > { %s2013_s19 = sadd.s32 4294967295, %s1953_s18   ;;  %s1274_s20 = sadd.s32 4294967294, %s1953_s18   ;;  %s1953_s18 = sphi %s1998_s18, %s2574_s18   ;;  %s1949_s17 = sphi %s1996_s17, %s2573_s17   ;;  %s1945_s16 = sphi %s1994_s16, %s2572_s16   ;;  %s1941_s15 = sphi %s1992_s15, %s2571_s15  }
   0x7   : > { %s2017_s21 = sadd.s32 1, %s1953_s18   ;;  %s49_s22 = sadd.s32 1, %s1949_s17 }
   0x8   : > { %s46_s23 = ssub.s32 %s1953_s18, %s2017_s21  ;;  %p56_p0 = scmp.ne.s32.totalorder %s1949_s17, %s1945_s16 }
   0x9   : > { %p47_p1 = scmp.eq.s32.totalorder %s46_s23, 0  ;;  %p57_p2 = scmp.eq.s32.totalorder %s1953_s18, 0 }
   0xa   : > { %p62_p3 = scmp.ne.s32.totalorder %s1945_s16, %s1941_s15  ;;  %p2552_p4 = scmp.eq.s32.totalorder %s2013_s19, 0 }
   0xb   : > { %s2029_s24 = scalar_select %p47_p1, %s1949_s17, %s49_s22  }
   0xc   : > { %p2031_p5 = por %p57_p2, %p56_p0  ;;  %p2037_p6 = por %p2552_p4, %p62_p3 }
   0xd   : > { %p128_p7 = scmp.eq.s32.totalorder %s2013_s19, 1  ;;  %p134_p8 = scmp.eq.s32.totalorder %s1274_s20, 1 }
   0xe   : > { %s2556_s26 = scalar_select %p2037_p6, 1, 0 }
   0xf   : > { %p1275_p9 = scmp.ge.s32.totalorder %s1953_s18, 1  ;;  %p141_p10 = scmp.lt.s32.totalorder %s1953_s18, 3 }
  0x10   : > { %p2044_p11 = por %p128_p7, %p56_p0  ;;  %p2048_p12 = por %p134_p8, %p62_p3 }
  0x11   : > { %p2052_p13 = pnand %p1275_p9, %p141_p10  ;;  %s1955_s30 = smov [#allocation7]  }
  0x12   : > { %s2557_s27 = scalar_select %p2044_p11, 1, 0 }
  0x13   : > { %s2558_s28 = scalar_select %p2048_p12, 1, 0 }
  0x14   : > { %s2559_s29 = scalar_select %p2052_p13, 1, 0 }
  0x15   : > { %p1722_p1 = pneg %p2052_p13  ;;  %s167_s5 = sshll.u32 %s1955_s30, 4  ;;  %s168_s5 = int_to_ptr.vmem [resolvable:$true] %s167_s5 }
  0x16   : > { %p1739_p3 = scmp.lt.s32.totalorder %s1953_s18, 2  ;;  %s1956_s7 = smov [#allocation2]  }
  0x17   : > { %p2060_p2 = pnand %p1722_p1, %p2552_p4  ;;  %s154_s8 = sshll.u32 %s1956_s7, 4  ;;  %s155_s8 = int_to_ptr.vmem [resolvable:$true] %s154_s8 }
  0x18   : > { %s1812_s9 = scalar_lea.vmem %s168_s5, 4096  ;;  %p1820_p12 = scmp.lt.s32.totalorder %s168_s5, %s168_s5 }
  0x19   : > { %p1803_p7 = pneg %p2060_p2  ;;  %p1813_p8 = scmp.ne.s32.totalorder %s168_s5, %s1812_s9 }
  0x1a   : > { %p1821_p11 = scmp.lt.s32.totalorder %s1812_s9, %s1812_s9 }
  0x1b   : > { %p1815_p9 = pnand %p1813_p8, %p1803_p7 }
  0x1c   : > { %p1822_p1 = por %p1821_p11, %p1820_p12 }
  0x1d   : > { %p1816_p10 = pneg %p1815_p9 }
  0x1f   : > { %p1823_p4 = pnand %p1822_p1, %p1816_p10 }
  0x21   : > { %1826 = shalt.err (!%p1823_p4)
}
  0x22   : > { %s1957_s10 = smov 256   ;;  %s1958_s11 = smov 16  }
  0x23   : > { %1728 = dma.hbm_to_vmem [thread:$0]  (!%p2060_p2), %s2549_s3, 4096, %s168_s5, [#allocation6], %s1957_s10, %s1957_s10, %s1958_s11  }
  0x24   : > { %p2080_p8 = pnand %p1739_p3, %p2031_p5  ;;  %s1838_s20 = scalar_lea.vmem %s155_s8, 128 }
  0x25   : > { %p1839_p4 = scmp.ne.s32.totalorder %s155_s8, %s1838_s20  ;;  %p1846_p9 = scmp.lt.s32.totalorder %s155_s8, %s155_s8 }
  0x26   : > { %p1847_p10 = scmp.lt.s32.totalorder %s1838_s20, %s1838_s20 }
  0x27   : > { %p1841_p11 = pnand %p1839_p4, %p1803_p7 }
  0x28   : > { %p1848_p1 = por %p1847_p10, %p1846_p9 }
  0x29   : > { %p1842_p12 = pneg %p1841_p11 }
  0x2b   : > { %p1849_p0 = pnand %p1848_p1, %p1842_p12 }
  0x2d   : > { %1852 = shalt.err (!%p1849_p0)
}
  0x2e   : > { %1725 = dma.hbm_to_vmem [thread:$0]  (!%p2060_p2), %s2546_s0, 128, %s155_s8, [#allocation3]  }
  0x2f   : > { %s181_s25 = sand.u32 1, %s1953_s18   ;;  %s183_s30 = sand.u32 1, %s1949_s17  }
  0x30   : > { %s1279_s5 = sshll.u32 %s183_s30, 10  ;;  %s1292_s7 = sshll.u32 %s1953_s18, 14 }
  0x31   : > { %s2098_s11 = scalar_lea.hbm %s2547_s1, %s1292_s7  ;;  %s185_s6 = scalar_lea.vmem [#allocation5], %s1279_s5 }
  0x32   : > { %s192_s12 = sshll.u32 %s185_s6, 4  ;;  %s2102_s13 = scalar_lea.sflag [#allocation6], %s181_s25  ;;  %s2100_s12 = int_to_ptr.vmem [resolvable:$true] %s192_s12 }
  0x33   : > { %s1853_s20 = scalar_lea.hbm %s2098_s11, 16384  ;;  %p1855_p2 = pneg %p2080_p8 }
  0x34   : > { %p1854_p5 = scmp.ne.s32.totalorder %s2098_s11, %s1853_s20  ;;  %s1858_s23 = scalar_lea.hbm %s2547_s1, 32768 }
  0x35   : > { %p1859_p7 = scmp.lt.s32.totalorder %s2098_s11, %s2547_s1  ;;  %p1860_p4 = scmp.lt.s32.totalorder %s1858_s23, %s1853_s20 }
  0x36   : > { %p1856_p0 = pnand %p1855_p2, %p1854_p5 }
  0x37   : > { %p1861_p11 = por %p1860_p4, %p1859_p7 }
  0x38   : > { %p1857_p3 = pneg %p1856_p0 }
  0x3a   : > { %p1862_p12 = pnand %p1861_p11, %p1857_p3 }
  0x3c   : > { %1865 = shalt.err (!%p1862_p12)
}
  0x3d   : > { %s1866_s25 = scalar_lea.vmem %s2100_s12, 16384  ;;  %s1959_s5 = smov [#allocation5]  }
  0x3e   : > { %p1867_p9 = scmp.ne.s32.totalorder %s2100_s12, %s1866_s25  ;;  %s1871_s9 = sshll.u32 %s1959_s5, 4  ;;  %s1872_s9 = int_to_ptr.vmem [resolvable:$false] %s1871_s9 }
  0x3f   : > { %s1873_s10 = scalar_lea.vmem %s1872_s9, 32768  ;;  %p1874_p5 = scmp.lt.s32.totalorder %s2100_s12, %s1872_s9 }
  0x40   : > { %p1869_p10 = pnand %p1867_p9, %p1855_p2  ;;  %p1875_p0 = scmp.lt.s32.totalorder %s1873_s10, %s1866_s25 }
  0x42   : > { %p1870_p1 = pneg %p1869_p10  ;;  %p1876_p6 = por %p1875_p0, %p1874_p5 }
  0x44   : > { %p1877_p13 = pnand %p1876_p6, %p1870_p1 }
  0x46   : > { %1880 = shalt.err (!%p1877_p13)
}
  0x47   : > { %s1960_s6 = smov 128   ;;  %s1961_s20 = smov 8  }
  0x48   : > { %1732 = dma.hbm_to_vmem [thread:$0]  (!%p2080_p8), %s2098_s11, 16384, %s2100_s12, %s2102_s13, %s1960_s6, %s1960_s6, %s1961_s20  }
  0x49   : > { %p2562_p2 = scmp.ne.s32.totalorder %s2559_s29, 0 }
  0x4a   : > { %p2563_p3 = scmp.eq.s32.totalorder (!%p2562_p2), %s2013_s19, 0 }
  0x4b   : > { %204 = sbr.rel (%p2562_p2) target bundleno = 819 (0x333), region = 36 }
  0x50   : > { %1924 = dma.done.wait (%p2563_p3), [#allocation3], 128   ;;  %p2564_p7 = pmov %p2563_p3 }
  0x51   : > { %s210_s8 = sand.u32 1, %s2013_s19   ;;  %s2131_s22 = sand.u32 1, %s1945_s16  }
  0x52   : > { %1926 = vsyncadd (%p2564_p7), [#allocation3], 4294967168  ;;  %s1284_s23 = sshll.u32 %s2131_s22, 10  ;;  %s211_s30 = scalar_lea.sflag [#allocation6], %s210_s8 }
  0x53   : > { %s2134_s14 = scalar_lea.vmem [#allocation5], %s1284_s23  ;;  %p2565_p6 = scmp.ne.s32.totalorder %s2556_s26, 0 }
  0x55   : > { %1928 = dma.done.wait (%p2565_p6), %s211_s30, 16384  }
  0x56   : > { %1930 = vsyncadd (%p2565_p6), %s211_s30, 4294950912  ;;  %p2566_p13 = pmov %p2563_p3 }
  0x57   : > { %p2567_p8 = pmov %p2563_p3 }
  0x58   : > { %1932 = dma.done.wait (%p2566_p13), [#allocation6], 4096  }
  0x59   : > { %1934 = vsyncadd (%p2567_p8), [#allocation6], 4294963200  ;;  %v1962_v0 = vmov 0.0   ;;  %vm1963_vm0 = vmmov 0   ;;  %v258_v1 = vld [vmem:[%s2134_s14 + $0x78] sm:$0xff]  ;;  %v257_v3 = vld [vmem:[%s2134_s14 + $0x70] sm:$0xff] }
  0x5a   : > { %1430 = vmatprep.subr.mxu1 %v1962_v0  ;;  %1500 = vmatprep.subr.mxu0 %v1962_v0  ;;  %v290_v2 = vld [vmem:[%s2134_s14 + $0x178] sm:$0xff]  ;;  %v289_v4 = vld [vmem:[%s2134_s14 + $0x170] sm:$0xff]  ;;  %v256_v5 = vld [vmem:[%s2134_s14 + $0x68] sm:$0xff]  ;;  %s1286_s11 = sshll.u32 %s2131_s22, 7  ;;  %s1293_s13 = sshll.u32 %s2013_s19, 11 }
  0x5b   : > { %1462 = vmatprep.mubr.msk.f32.mxu1 %vm1963_vm0, %v1962_v0  ;;  %1532 = vmatprep.mubr.msk.f32.mxu0 %vm1963_vm0, %v1962_v0  ;;  %v288_v6 = vld [vmem:[%s2134_s14 + $0x168] sm:$0xff]  ;;  %v255_v7 = vld [vmem:[%s2134_s14 + $0x60] sm:$0xff]  ;;  %v254_v9 = vld [vmem:[%s2134_s14 + $0x58] sm:$0xff]  ;;  %s2478_s12 = scalar_lea.vmem [#allocation8], %s1286_s11  ;;  %s2499_s9 = scalar_lea.hbm %s2550_s4, %s1293_s13 }
  0x5c   : > { %1431 = vmatpush3.msra.mxu1 %v258_v1  ;;  %1501 = vmatpush3.msra.mxu0 %v290_v2  ;;  %v287_v8 = vld [vmem:[%s2134_s14 + $0x160] sm:$0xff]  ;;  %v286_v10 = vld [vmem:[%s2134_s14 + $0x158] sm:$0xff]  ;;  %v253_v11 = vld [vmem:[%s2134_s14 + $0x50] sm:$0xff]  ;;  %s1180_s7 = sshll.u32 %s2478_s12, 4  ;;  %s1167_s10 = scalar_lea.sflag [#allocation4], %s2131_s22  ;;  %s2501_s7 = int_to_ptr.vmem [resolvable:$true] %s1180_s7 }
  0x5d   : > { %1432 = vmatprep.subr.mxu1 %v1962_v0  ;;  %1502 = vmatprep.subr.mxu0 %v1962_v0  ;;  %v285_v12 = vld [vmem:[%s2134_s14 + $0x150] sm:$0xff]  ;;  %v252_v13 = vld [vmem:[%s2134_s14 + $0x48] sm:$0xff]  ;;  %v251_v15 = vld [vmem:[%s2134_s14 + $0x40] sm:$0xff]  ;;  %s1881_s6 = scalar_lea.vmem %s2501_s7, 2048  ;;  %p2568_p11 = scmp.ne.s32.totalorder %s2557_s27, 0 }
  0x5e   : > { %1433 = vmatpush3.msra.mxu1 %v257_v3  ;;  %1503 = vmatpush3.msra.mxu0 %v289_v4  ;;  %v284_v14 = vld [vmem:[%s2134_s14 + $0x148] sm:$0xff]  ;;  %v283_v16 = vld [vmem:[%s2134_s14 + $0x140] sm:$0xff]  ;;  %v250_v17 = vld [vmem:[%s2134_s14 + $0x38] sm:$0xff]  ;;  %p1882_p4 = scmp.ne.s32.totalorder %s2501_s7, %s1881_s6  ;;  %s1964_s19 = smov [#allocation8]  }
  0x5f   : > { %1434 = vmatprep.subr.mxu1 %v1962_v0  ;;  %1504 = vmatprep.subr.mxu0 %v1962_v0  ;;  %v282_v18 = vld [vmem:[%s2134_s14 + $0x138] sm:$0xff]  ;;  %v249_v19 = vld [vmem:[%s2134_s14 + $0x30] sm:$0xff]  ;;  %v248_v21 = vld [vmem:[%s2134_s14 + $0x28] sm:$0xff]  ;;  %s1885_s20 = sshll.u32 %s1964_s19, 4  ;;  %s1886_s20 = int_to_ptr.vmem [resolvable:$false] %s1885_s20 }
  0x60   : > { %1435 = vmatpush3.msra.mxu1 %v256_v5  ;;  %1505 = vmatpush3.msra.mxu0 %v288_v6  ;;  %v281_v20 = vld [vmem:[%s2134_s14 + $0x130] sm:$0xff]  ;;  %v280_v22 = vld [vmem:[%s2134_s14 + $0x128] sm:$0xff]  ;;  %v247_v23 = vld [vmem:[%s2134_s14 + $0x20] sm:$0xff]  ;;  %p1883_p12 = pnand %p1882_p4, %p2568_p11  ;;  %s1887_s8 = scalar_lea.vmem %s1886_s20, 4096 }
  0x61   : > { %1436 = vmatprep.subr.mxu1 %v1962_v0  ;;  %1506 = vmatprep.subr.mxu0 %v1962_v0  ;;  %v279_v24 = vld [vmem:[%s2134_s14 + $0x120] sm:$0xff]  ;;  %v246_v25 = vld [vmem:[%s2134_s14 + $0x18] sm:$0xff]  ;;  %v245_v27 = vld [vmem:[%s2134_s14 + $0x10] sm:$0xff]  ;;  %p1888_p10 = scmp.lt.s32.totalorder %s2501_s7, %s1886_s20  ;;  %p1889_p1 = scmp.lt.s32.totalorder %s1887_s8, %s1881_s6 }
  0x62   : > { %1437 = vmatpush3.msra.mxu1 %v255_v7  ;;  %1507 = vmatpush3.msra.mxu0 %v287_v8  ;;  %v278_v26 = vld [vmem:[%s2134_s14 + $0x118] sm:$0xff]  ;;  %v277_v28 = vld [vmem:[%s2134_s14 + $0x110] sm:$0xff]  ;;  %v244_v29 = vld [vmem:[%s2134_s14 + $0x8] sm:$0xff]  ;;  %p1884_p9 = pneg %p1883_p12 }
  0x63   : > { %1438 = vmatprep.subr.mxu1 %v1962_v0  ;;  %1508 = vmatprep.subr.mxu0 %v1962_v0  ;;  %v276_v30 = vld [vmem:[%s2134_s14 + $0x108] sm:$0xff]  ;;  %v243_v31 = vld [vmem:[%s2134_s14] sm:$0xff]  ;;  %v2210_v33 = vld [vmem:[#allocation2] sm:$0xff]  ;;  %p1890_p5 = por %p1889_p1, %p1888_p10 }
  0x64   : > { %1439 = vmatpush3.msra.mxu1 %v254_v9  ;;  %1509 = vmatpush3.msra.mxu0 %v286_v10  ;;  %v275_v32 = vld [vmem:[%s2134_s14 + $0x100] sm:$0xff]  ;;  %v274_v34 = vld [vmem:[%s2134_s14 + $0xf8] sm:$0xff]  ;;  %v273_v36 = vld [vmem:[%s2134_s14 + $0xf0] sm:$0xff] }
  0x65   : > { %1440 = vmatprep.subr.mxu1 %v1962_v0  ;;  %1510 = vmatprep.subr.mxu0 %v1962_v0  ;;  %v322_v35 = vld [vmem:[%s2134_s14 + $0x278] sm:$0xff]  ;;  %v321_v37 = vld [vmem:[%s2134_s14 + $0x270] sm:$0xff]  ;;  %v272_v38 = vld [vmem:[%s2134_s14 + $0xe8] sm:$0xff]  ;;  %p1891_p0 = pnand %p1890_p5, %p1884_p9 }
  0x66   : > { %1441 = vmatpush3.msra.mxu1 %v253_v11  ;;  %1511 = vmatpush3.msra.mxu0 %v285_v12  ;;  %v320_v39 = vld [vmem:[%s2134_s14 + $0x268] sm:$0xff]  ;;  %v271_v40 = vld [vmem:[%s2134_s14 + $0xe0] sm:$0xff]  ;;  %v270_v42 = vld [vmem:[%s2134_s14 + $0xd8] sm:$0xff] }
  0x67   : > { %1442 = vmatprep.subr.mxu1 %v1962_v0  ;;  %1512 = vmatprep.subr.mxu0 %v1962_v0  ;;  %v319_v41 = vld [vmem:[%s2134_s14 + $0x260] sm:$0xff]  ;;  %v318_v43 = vld [vmem:[%s2134_s14 + $0x258] sm:$0xff]  ;;  %v269_v44 = vld [vmem:[%s2134_s14 + $0xd0] sm:$0xff] }
  0x68   : > { %1443 = vmatpush3.msra.mxu1 %v252_v13  ;;  %1513 = vmatpush3.msra.mxu0 %v284_v14  ;;  %v317_v45 = vld [vmem:[%s2134_s14 + $0x250] sm:$0xff]  ;;  %v268_v46 = vld [vmem:[%s2134_s14 + $0xc8] sm:$0xff]  ;;  %v267_v48 = vld [vmem:[%s2134_s14 + $0xc0] sm:$0xff] }
  0x69   : > { %1444 = vmatprep.subr.mxu1 %v1962_v0  ;;  %1514 = vmatprep.subr.mxu0 %v1962_v0  ;;  %v316_v47 = vld [vmem:[%s2134_s14 + $0x248] sm:$0xff]  ;;  %v315_v49 = vld [vmem:[%s2134_s14 + $0x240] sm:$0xff]  ;;  %v266_v50 = vld [vmem:[%s2134_s14 + $0xb8] sm:$0xff] }
  0x6a   : > { %1445 = vmatpush3.msra.mxu1 %v251_v15  ;;  %1515 = vmatpush3.msra.mxu0 %v283_v16  ;;  %v314_v51 = vld [vmem:[%s2134_s14 + $0x238] sm:$0xff]  ;;  %v265_v52 = vld [vmem:[%s2134_s14 + $0xb0] sm:$0xff]  ;;  %v264_v54 = vld [vmem:[%s2134_s14 + $0xa8] sm:$0xff] }
  0x6b   : > { %1446 = vmatprep.subr.mxu1 %v1962_v0  ;;  %1516 = vmatprep.subr.mxu0 %v1962_v0  ;;  %v313_v53 = vld [vmem:[%s2134_s14 + $0x230] sm:$0xff]  ;;  %v312_v55 = vld [vmem:[%s2134_s14 + $0x228] sm:$0xff]  ;;  %v263_v56 = vld [vmem:[%s2134_s14 + $0xa0] sm:$0xff] }
  0x6c   : > { %1447 = vmatpush3.msra.mxu1 %v250_v17  ;;  %1517 = vmatpush3.msra.mxu0 %v282_v18  ;;  %v311_v57 = vld [vmem:[%s2134_s14 + $0x220] sm:$0xff]  ;;  %v262_v58 = vld [vmem:[%s2134_s14 + $0x98] sm:$0xff]  ;;  %v261_v60 = vld [vmem:[%s2134_s14 + $0x90] sm:$0xff] }
  0x6d   : > { %1448 = vmatprep.subr.mxu1 %v1962_v0  ;;  %1518 = vmatprep.subr.mxu0 %v1962_v0  ;;  %v310_v59 = vld [vmem:[%s2134_s14 + $0x218] sm:$0xff]  ;;  %v309_v61 = vld [vmem:[%s2134_s14 + $0x210] sm:$0xff]  ;;  %v260_v62 = vld [vmem:[%s2134_s14 + $0x88] sm:$0xff] }
  0x6e   : > { %1449 = vmatpush3.msra.mxu1 %v249_v19  ;;  %1519 = vmatpush3.msra.mxu0 %v281_v20  ;;  %v308_v63 = vld [vmem:[%s2134_s14 + $0x208] sm:$0xff]  ;;  %v259_v1 = vld [vmem:[%s2134_s14 + $0x80] sm:$0xff]  ;;  %v306_v3 = vld [vmem:[%s2134_s14 + $0x1f8] sm:$0xff] }
  0x6f   : > { %1450 = vmatprep.subr.mxu1 %v1962_v0  ;;  %1520 = vmatprep.subr.mxu0 %v1962_v0  ;;  %v307_v2 = vld [vmem:[%s2134_s14 + $0x200] sm:$0xff]  ;;  %v354_v4 = vld [vmem:[%s2134_s14 + $0x378] sm:$0xff]  ;;  %v305_v5 = vld [vmem:[%s2134_s14 + $0x1f0] sm:$0xff] }
  0x70   : > { %1451 = vmatpush3.msra.mxu1 %v248_v21  ;;  %1521 = vmatpush3.msra.mxu0 %v280_v22  ;;  %v353_v6 = vld [vmem:[%s2134_s14 + $0x370] sm:$0xff]  ;;  %v304_v7 = vld [vmem:[%s2134_s14 + $0x1e8] sm:$0xff]  ;;  %v303_v9 = vld [vmem:[%s2134_s14 + $0x1e0] sm:$0xff] }
  0x71   : > { %1452 = vmatprep.subr.mxu1 %v1962_v0  ;;  %1522 = vmatprep.subr.mxu0 %v1962_v0  ;;  %v352_v8 = vld [vmem:[%s2134_s14 + $0x368] sm:$0xff]  ;;  %v351_v10 = vld [vmem:[%s2134_s14 + $0x360] sm:$0xff]  ;;  %v302_v11 = vld [vmem:[%s2134_s14 + $0x1d8] sm:$0xff] }
  0x72   : > { %1453 = vmatpush3.msra.mxu1 %v247_v23  ;;  %1523 = vmatpush3.msra.mxu0 %v279_v24  ;;  %v350_v12 = vld [vmem:[%s2134_s14 + $0x358] sm:$0xff]  ;;  %v301_v13 = vld [vmem:[%s2134_s14 + $0x1d0] sm:$0xff]  ;;  %v300_v15 = vld [vmem:[%s2134_s14 + $0x1c8] sm:$0xff] }
  0x73   : > { %1454 = vmatprep.subr.mxu1 %v1962_v0  ;;  %1524 = vmatprep.subr.mxu0 %v1962_v0  ;;  %v349_v14 = vld [vmem:[%s2134_s14 + $0x350] sm:$0xff]  ;;  %v348_v16 = vld [vmem:[%s2134_s14 + $0x348] sm:$0xff]  ;;  %v299_v17 = vld [vmem:[%s2134_s14 + $0x1c0] sm:$0xff] }
  0x74   : > { %1455 = vmatpush3.msra.mxu1 %v246_v25  ;;  %1525 = vmatpush3.msra.mxu0 %v278_v26  ;;  %v347_v18 = vld [vmem:[%s2134_s14 + $0x340] sm:$0xff]  ;;  %v298_v19 = vld [vmem:[%s2134_s14 + $0x1b8] sm:$0xff]  ;;  %v297_v21 = vld [vmem:[%s2134_s14 + $0x1b0] sm:$0xff] }
  0x75   : > { %1456 = vmatprep.subr.mxu1 %v1962_v0  ;;  %1526 = vmatprep.subr.mxu0 %v1962_v0  ;;  %v346_v20 = vld [vmem:[%s2134_s14 + $0x338] sm:$0xff]  ;;  %v345_v22 = vld [vmem:[%s2134_s14 + $0x330] sm:$0xff]  ;;  %v296_v23 = vld [vmem:[%s2134_s14 + $0x1a8] sm:$0xff] }
  0x76   : > { %1457 = vmatpush3.msra.mxu1 %v245_v27  ;;  %1527 = vmatpush3.msra.mxu0 %v277_v28  ;;  %v344_v24 = vld [vmem:[%s2134_s14 + $0x328] sm:$0xff]  ;;  %v295_v25 = vld [vmem:[%s2134_s14 + $0x1a0] sm:$0xff]  ;;  %v294_v27 = vld [vmem:[%s2134_s14 + $0x198] sm:$0xff] }
  0x77   : > { %1458 = vmatprep.subr.mxu1 %v1962_v0  ;;  %1528 = vmatprep.subr.mxu0 %v1962_v0  ;;  %v343_v26 = vld [vmem:[%s2134_s14 + $0x320] sm:$0xff]  ;;  %v342_v28 = vld [vmem:[%s2134_s14 + $0x318] sm:$0xff] }
  0x78   : > { %1459 = vmatpush3.msra.mxu1 %v244_v29  ;;  %1529 = vmatpush3.msra.mxu0 %v276_v30  ;;  %v293_v29 = vld [vmem:[%s2134_s14 + $0x190] sm:$0xff] }
  0x79   : > { %1460 = vmatprep.subr.mxu1 %v1962_v0  ;;  %1530 = vmatprep.subr.mxu0 %v1962_v0  ;;  %v341_v30 = vld [vmem:[%s2134_s14 + $0x310] sm:$0xff] }
  0x7a   : > { %1461 = vmatpush3.msra.mxu1 %v243_v31  ;;  %1531 = vmatpush3.msra.mxu0 %v275_v32  ;;  %v292_v31 = vld [vmem:[%s2134_s14 + $0x188] sm:$0xff] }
  0x7b   : > { %1463 = vmatmul.mubr.f32.vlgmr.msra.gmra.mxu1 %v2210_v33  ;;  %1465 = vmatprep.subr.mxu1 %v1962_v0  ;;  %v340_v32 = vld [vmem:[%s2134_s14 + $0x308] sm:$0xff] }
  0x7c   : > { %1533 = vmatmul.mubr.f32.vlgmr.msra.gmra.mxu0 %v2210_v33  ;;  %1570 = vmatprep.subr.mxu0 %v1962_v0 }
  0x7d   : > { %1466 = vmatpush3.msra.mxu1 %v274_v34  ;;  %1571 = vmatpush3.msra.mxu0 %v322_v35  ;;  %v291_v34 = vld [vmem:[%s2134_s14 + $0x180] sm:$0xff] }
  0x7e   : > { %1467 = vmatprep.subr.mxu1 %v1962_v0  ;;  %1572 = vmatprep.subr.mxu0 %v1962_v0  ;;  %v339_v35 = vld [vmem:[%s2134_s14 + $0x300] sm:$0xff] }
  0x7f   : > { %1468 = vmatpush3.msra.mxu1 %v273_v36  ;;  %1573 = vmatpush3.msra.mxu0 %v321_v37  ;;  %v338_v36 = vld [vmem:[%s2134_s14 + $0x2f8] sm:$0xff]  ;;  %v337_v37 = vld [vmem:[%s2134_s14 + $0x2f0] sm:$0xff] }
  0x80   : > { %1469 = vmatprep.subr.mxu1 %v1962_v0  ;;  %1574 = vmatprep.subr.mxu0 %v1962_v0 }
  0x81   : > { %1470 = vmatpush3.msra.mxu1 %v272_v38  ;;  %1575 = vmatpush3.msra.mxu0 %v320_v39  ;;  %v336_v38 = vld [vmem:[%s2134_s14 + $0x2e8] sm:$0xff]  ;;  %v335_v39 = vld [vmem:[%s2134_s14 + $0x2e0] sm:$0xff] }
  0x82   : > { %1471 = vmatprep.subr.mxu1 %v1962_v0  ;;  %1576 = vmatprep.subr.mxu0 %v1962_v0 }
  0x83   : > { %1472 = vmatpush3.msra.mxu1 %v271_v40  ;;  %1577 = vmatpush3.msra.mxu0 %v319_v41  ;;  %v334_v40 = vld [vmem:[%s2134_s14 + $0x2d8] sm:$0xff]  ;;  %v333_v41 = vld [vmem:[%s2134_s14 + $0x2d0] sm:$0xff] }
  0x84   : > { %1473 = vmatprep.subr.mxu1 %v1962_v0  ;;  %1578 = vmatprep.subr.mxu0 %v1962_v0 }
  0x85   : > { %1474 = vmatpush3.msra.mxu1 %v270_v42  ;;  %1579 = vmatpush3.msra.mxu0 %v318_v43  ;;  %v332_v42 = vld [vmem:[%s2134_s14 + $0x2c8] sm:$0xff]  ;;  %v331_v43 = vld [vmem:[%s2134_s14 + $0x2c0] sm:$0xff] }
  0x86   : > { %1475 = vmatprep.subr.mxu1 %v1962_v0  ;;  %1580 = vmatprep.subr.mxu0 %v1962_v0 }
  0x87   : > { %1476 = vmatpush3.msra.mxu1 %v269_v44  ;;  %1581 = vmatpush3.msra.mxu0 %v317_v45  ;;  %v330_v44 = vld [vmem:[%s2134_s14 + $0x2b8] sm:$0xff]  ;;  %v329_v45 = vld [vmem:[%s2134_s14 + $0x2b0] sm:$0xff] }
  0x88   : > { %1477 = vmatprep.subr.mxu1 %v1962_v0  ;;  %1582 = vmatprep.subr.mxu0 %v1962_v0 }
  0x89   : > { %1478 = vmatpush3.msra.mxu1 %v268_v46  ;;  %1583 = vmatpush3.msra.mxu0 %v316_v47  ;;  %v328_v46 = vld [vmem:[%s2134_s14 + $0x2a8] sm:$0xff]  ;;  %v327_v47 = vld [vmem:[%s2134_s14 + $0x2a0] sm:$0xff] }
  0x8a   : > { %1479 = vmatprep.subr.mxu1 %v1962_v0  ;;  %1584 = vmatprep.subr.mxu0 %v1962_v0 }
  0x8b   : > { %1480 = vmatpush3.msra.mxu1 %v267_v48  ;;  %1585 = vmatpush3.msra.mxu0 %v315_v49  ;;  %v326_v48 = vld [vmem:[%s2134_s14 + $0x298] sm:$0xff]  ;;  %v325_v49 = vld [vmem:[%s2134_s14 + $0x290] sm:$0xff] }
  0x8c   : > { %1481 = vmatprep.subr.mxu1 %v1962_v0  ;;  %1586 = vmatprep.subr.mxu0 %v1962_v0 }
  0x8d   : > { %1482 = vmatpush3.msra.mxu1 %v266_v50  ;;  %1587 = vmatpush3.msra.mxu0 %v314_v51  ;;  %v324_v50 = vld [vmem:[%s2134_s14 + $0x288] sm:$0xff]  ;;  %v323_v51 = vld [vmem:[%s2134_s14 + $0x280] sm:$0xff] }
  0x8e   : > { %1483 = vmatprep.subr.mxu1 %v1962_v0  ;;  %1588 = vmatprep.subr.mxu0 %v1962_v0 }
  0x8f   : > { %1484 = vmatpush3.msra.mxu1 %v265_v52  ;;  %1589 = vmatpush3.msra.mxu0 %v313_v53  ;;  %v370_v52 = vld [vmem:[%s2134_s14 + $0x3f8] sm:$0xff]  ;;  %v369_v53 = vld [vmem:[%s2134_s14 + $0x3f0] sm:$0xff] }
  0x90   : > { %1485 = vmatprep.subr.mxu1 %v1962_v0  ;;  %1590 = vmatprep.subr.mxu0 %v1962_v0 }
  0x91   : > { %1486 = vmatpush3.msra.mxu1 %v264_v54  ;;  %1591 = vmatpush3.msra.mxu0 %v312_v55  ;;  %v368_v54 = vld [vmem:[%s2134_s14 + $0x3e8] sm:$0xff]  ;;  %v367_v55 = vld [vmem:[%s2134_s14 + $0x3e0] sm:$0xff] }
  0x92   : > { %1487 = vmatprep.subr.mxu1 %v1962_v0  ;;  %1592 = vmatprep.subr.mxu0 %v1962_v0 }
  0x93   : > { %1488 = vmatpush3.msra.mxu1 %v263_v56  ;;  %1593 = vmatpush3.msra.mxu0 %v311_v57  ;;  %v366_v56 = vld [vmem:[%s2134_s14 + $0x3d8] sm:$0xff]  ;;  %v365_v57 = vld [vmem:[%s2134_s14 + $0x3d0] sm:$0xff] }
  0x94   : > { %1489 = vmatprep.subr.mxu1 %v1962_v0  ;;  %1594 = vmatprep.subr.mxu0 %v1962_v0 }
  0x95   : > { %1490 = vmatpush3.msra.mxu1 %v262_v58  ;;  %1595 = vmatpush3.msra.mxu0 %v310_v59  ;;  %v364_v58 = vld [vmem:[%s2134_s14 + $0x3c8] sm:$0xff]  ;;  %v363_v59 = vld [vmem:[%s2134_s14 + $0x3c0] sm:$0xff] }
  0x96   : > { %1491 = vmatprep.subr.mxu1 %v1962_v0  ;;  %1596 = vmatprep.subr.mxu0 %v1962_v0 }
  0x97   : > { %1492 = vmatpush3.msra.mxu1 %v261_v60  ;;  %1597 = vmatpush3.msra.mxu0 %v309_v61  ;;  %v362_v60 = vld [vmem:[%s2134_s14 + $0x3b8] sm:$0xff]  ;;  %v361_v61 = vld [vmem:[%s2134_s14 + $0x3b0] sm:$0xff] }
  0x98   : > { %1493 = vmatprep.subr.mxu1 %v1962_v0  ;;  %1598 = vmatprep.subr.mxu0 %v1962_v0 }
  0x99   : > { %1494 = vmatpush3.msra.mxu1 %v260_v62  ;;  %1599 = vmatpush3.msra.mxu0 %v308_v63  ;;  %v360_v62 = vld [vmem:[%s2134_s14 + $0x3a8] sm:$0xff]  ;;  %v359_v63 = vld [vmem:[%s2134_s14 + $0x3a0] sm:$0xff] }
  0x9a   : > { %1495 = vmatprep.subr.mxu1 %v1962_v0  ;;  %1600 = vmatprep.subr.mxu0 %v1962_v0 }
  0x9b   : > { %1496 = vmatpush3.msra.mxu1 %v259_v1  ;;  %1497 = vmatprep.mubr.msk.f32.mxu1 %vm1963_vm0, %v1962_v0  ;;  %v358_v1 = vld [vmem:[%s2134_s14 + $0x398] sm:$0xff] }
  0x9c   : > { %1601 = vmatpush3.msra.mxu0 %v307_v2  ;;  %1498 = vmatmul.mubr.f32.vlgmr.msra.gmra.mxu1 %v2210_v33  ;;  %v357_v2 = vld [vmem:[%s2134_s14 + $0x390] sm:$0xff] }
  0x9d   : > { %1535 = vmatprep.subr.mxu1 %v1962_v0  ;;  %1602 = vmatprep.mubr.msk.f32.mxu0 %vm1963_vm0, %v1962_v0 }
  0x9e   : > { %1640 = vmatprep.subr.mxu0 %v1962_v0  ;;  %1536 = vmatpush3.msra.mxu1 %v306_v3  ;;  %v356_v3 = vld [vmem:[%s2134_s14 + $0x388] sm:$0xff] }
  0x9f   : > { %1603 = vmatmul.mubr.f32.vlgmr.msra.gmra.mxu0 %v2210_v33  ;;  %1537 = vmatprep.subr.mxu1 %v1962_v0 }
  0xa0   : > { %1641 = vmatpush3.msra.mxu0 %v354_v4  ;;  %1538 = vmatpush3.msra.mxu1 %v305_v5  ;;  %v355_v4 = vld [vmem:[%s2134_s14 + $0x380] sm:$0xff] }
  0xa1   : > { %1642 = vmatprep.subr.mxu0 %v1962_v0  ;;  %1539 = vmatprep.subr.mxu1 %v1962_v0 }
  0xa2   : > { %1643 = vmatpush3.msra.mxu0 %v353_v6  ;;  %1540 = vmatpush3.msra.mxu1 %v304_v7 }
  0xa3   : > { %1644 = vmatprep.subr.mxu0 %v1962_v0  ;;  %1541 = vmatprep.subr.mxu1 %v1962_v0 }
  0xa4   : > { %1645 = vmatpush3.msra.mxu0 %v352_v8  ;;  %1542 = vmatpush3.msra.mxu1 %v303_v9 }
  0xa5   : > { %1646 = vmatprep.subr.mxu0 %v1962_v0  ;;  %1543 = vmatprep.subr.mxu1 %v1962_v0 }
  0xa6   : > { %1647 = vmatpush3.msra.mxu0 %v351_v10  ;;  %1544 = vmatpush3.msra.mxu1 %v302_v11  ;;  %v1036_v11 = vld [vmem:[#allocation7 + $0xf8] sm:$0xff] }
  0xa7   : > { %1648 = vmatprep.subr.mxu0 %v1962_v0  ;;  %1545 = vmatprep.subr.mxu1 %v1962_v0 }
  0xa8   : > { %1649 = vmatpush3.msra.mxu0 %v350_v12  ;;  %1546 = vmatpush3.msra.mxu1 %v301_v13  ;;  %v1035_v12 = vld [vmem:[#allocation7 + $0xf0] sm:$0xff]  ;;  %v1034_v13 = vld [vmem:[#allocation7 + $0xe8] sm:$0xff] }
  0xa9   : > { %1650 = vmatprep.subr.mxu0 %v1962_v0  ;;  %1547 = vmatprep.subr.mxu1 %v1962_v0 }
  0xaa   : > { %1651 = vmatpush3.msra.mxu0 %v349_v14  ;;  %1548 = vmatpush3.msra.mxu1 %v300_v15  ;;  %v1033_v14 = vld [vmem:[#allocation7 + $0xe0] sm:$0xff]  ;;  %v1031_v15 = vld [vmem:[#allocation7 + $0xd0] sm:$0xff] }
  0xab   : > { %1652 = vmatprep.subr.mxu0 %v1962_v0  ;;  %1549 = vmatprep.subr.mxu1 %v1962_v0 }
  0xac   : > { %1653 = vmatpush3.msra.mxu0 %v348_v16  ;;  %1550 = vmatpush3.msra.mxu1 %v299_v17  ;;  %v1030_v16 = vld [vmem:[#allocation7 + $0xc8] sm:$0xff]  ;;  %v1029_v17 = vld [vmem:[#allocation7 + $0xc0] sm:$0xff] }
  0xad   : > { %1654 = vmatprep.subr.mxu0 %v1962_v0  ;;  %1551 = vmatprep.subr.mxu1 %v1962_v0 }
  0xae   : > { %1655 = vmatpush3.msra.mxu0 %v347_v18  ;;  %1552 = vmatpush3.msra.mxu1 %v298_v19  ;;  %v1028_v18 = vld [vmem:[#allocation7 + $0xb8] sm:$0xff]  ;;  %v1027_v19 = vld [vmem:[#allocation7 + $0xb0] sm:$0xff] }
  0xaf   : > { %1656 = vmatprep.subr.mxu0 %v1962_v0  ;;  %1553 = vmatprep.subr.mxu1 %v1962_v0 }
  0xb0   : > { %1657 = vmatpush3.msra.mxu0 %v346_v20  ;;  %1554 = vmatpush3.msra.mxu1 %v297_v21  ;;  %v1026_v20 = vld [vmem:[#allocation7 + $0xa8] sm:$0xff]  ;;  %v1025_v21 = vld [vmem:[#allocation7 + $0xa0] sm:$0xff] }
  0xb1   : > { %1658 = vmatprep.subr.mxu0 %v1962_v0  ;;  %1555 = vmatprep.subr.mxu1 %v1962_v0 }
  0xb2   : > { %1659 = vmatpush3.msra.mxu0 %v345_v22  ;;  %1556 = vmatpush3.msra.mxu1 %v296_v23  ;;  %v1024_v22 = vld [vmem:[#allocation7 + $0x98] sm:$0xff]  ;;  %v1023_v23 = vld [vmem:[#allocation7 + $0x90] sm:$0xff] }
  0xb3   : > { %1660 = vmatprep.subr.mxu0 %v1962_v0  ;;  %1557 = vmatprep.subr.mxu1 %v1962_v0 }
  0xb4   : > { %1661 = vmatpush3.msra.mxu0 %v344_v24  ;;  %1558 = vmatpush3.msra.mxu1 %v295_v25  ;;  %v1022_v24 = vld [vmem:[#allocation7 + $0x88] sm:$0xff]  ;;  %v1021_v25 = vld [vmem:[#allocation7 + $0x80] sm:$0xff] }
  0xb5   : > { %1662 = vmatprep.subr.mxu0 %v1962_v0  ;;  %1559 = vmatprep.subr.mxu1 %v1962_v0 }
  0xb6   : > { %1663 = vmatpush3.msra.mxu0 %v343_v26  ;;  %1560 = vmatpush3.msra.mxu1 %v294_v27  ;;  %v1020_v26 = vld [vmem:[#allocation7 + $0x78] sm:$0xff]  ;;  %v1019_v27 = vld [vmem:[#allocation7 + $0x70] sm:$0xff] }
  0xb7   : > { %1664 = vmatprep.subr.mxu0 %v1962_v0  ;;  %1561 = vmatprep.subr.mxu1 %v1962_v0 }
  0xb8   : > { %1665 = vmatpush3.msra.mxu0 %v342_v28  ;;  %1562 = vmatpush3.msra.mxu1 %v293_v29  ;;  %v1018_v28 = vld [vmem:[#allocation7 + $0x68] sm:$0xff]  ;;  %v1017_v29 = vld [vmem:[#allocation7 + $0x60] sm:$0xff] }
  0xb9   : > { %1666 = vmatprep.subr.mxu0 %v1962_v0  ;;  %1563 = vmatprep.subr.mxu1 %v1962_v0 }
  0xba   : > { %1667 = vmatpush3.msra.mxu0 %v341_v30  ;;  %1564 = vmatpush3.msra.mxu1 %v292_v31  ;;  %v1016_v30 = vld [vmem:[#allocation7 + $0x58] sm:$0xff]  ;;  %v1015_v31 = vld [vmem:[#allocation7 + $0x50] sm:$0xff] }
  0xbb   : > { %1668 = vmatprep.subr.mxu0 %v1962_v0  ;;  %1565 = vmatprep.subr.mxu1 %v1962_v0 }
  0xbc   : > { %1669 = vmatpush3.msra.mxu0 %v340_v32  ;;  %1566 = vmatpush3.msra.mxu1 %v291_v34  ;;  %v1014_v32 = vld [vmem:[#allocation7 + $0x48] sm:$0xff]  ;;  %v1013_v34 = vld [vmem:[#allocation7 + $0x40] sm:$0xff] }
  0xbd   : > { %1670 = vmatprep.subr.mxu0 %v1962_v0  ;;  %1567 = vmatprep.mubr.msk.f32.mxu1 %vm1963_vm0, %v1962_v0 }
  0xbe   : > { %1671 = vmatpush3.msra.mxu0 %v339_v35  ;;  %1672 = vmatprep.mubr.msk.f32.mxu0 %vm1963_vm0, %v1962_v0  ;;  %v1012_v35 = vld [vmem:[#allocation7 + $0x38] sm:$0xff] }
  0xbf   : > { %1568 = vmatmul.mubr.f32.vlgmr.msra.gmra.mxu1 %v2210_v33  ;;  %1605 = vmatprep.subr.mxu1 %v1962_v0 }
  0xc0   : > { %1673 = vmatmul.mubr.f32.vlgmr.msra.gmra.mxu0 %v2210_v33  ;;  %1606 = vmatpush3.msra.mxu1 %v338_v36  ;;  %v1011_v36 = vld [vmem:[#allocation7 + $0x30] sm:$0xff] }
  0xc1   : > { %1607 = vmatprep.subr.mxu1 %v1962_v0  ;;  %1637 = vmatprep.mubr.msk.f32.mxu1 %vm1963_vm0, %v1962_v0 }
  0xc2   : > { %1608 = vmatpush3.msra.mxu1 %v337_v37  ;;  %1101 = vmatprep.mubr.f32.mxu0 %v1962_v0  ;;  %v1010_v37 = vld [vmem:[#allocation7 + $0x28] sm:$0xff] }
  0xc3   : > { %1609 = vmatprep.subr.mxu1 %v1962_v0  ;;  %1037 = vmatprep.subr.mxu0 %v1036_v11 }
  0xc4   : > { %1610 = vmatpush3.msra.mxu1 %v336_v38  ;;  %1038 = vmatpush1.msra.mxu0 %v1035_v12  ;;  %v1009_v38 = vld [vmem:[#allocation7 + $0x20] sm:$0xff] }
  0xc5   : > { %1611 = vmatprep.subr.mxu1 %v1962_v0  ;;  %1039 = vmatprep.subr.mxu0 %v1034_v13 }
  0xc6   : > { %1612 = vmatpush3.msra.mxu1 %v335_v39  ;;  %1040 = vmatpush1.msra.mxu0 %v1033_v14 }
  0xc7   : > { %1613 = vmatprep.subr.mxu1 %v1962_v0 }
  0xc8   : > { %1614 = vmatpush3.msra.mxu1 %v334_v40  ;;  %v1008_v40 = vld [vmem:[#allocation7 + $0x18] sm:$0xff] }
  0xc9   : > { %1615 = vmatprep.subr.mxu1 %v1962_v0 }
  0xca   : > { %1616 = vmatpush3.msra.mxu1 %v333_v41 }
  0xcb   : > { %1617 = vmatprep.subr.mxu1 %v1962_v0 }
  0xcc   : > { %1618 = vmatpush3.msra.mxu1 %v332_v42  ;;  %v1007_v42 = vld [vmem:[#allocation7 + $0x10] sm:$0xff] }
  0xcd   : > { %1619 = vmatprep.subr.mxu1 %v1962_v0 }
  0xce   : > { %1620 = vmatpush3.msra.mxu1 %v331_v43 }
  0xcf   : > { %1621 = vmatprep.subr.mxu1 %v1962_v0 }
  0xd0   : > { %1622 = vmatpush3.msra.mxu1 %v330_v44  ;;  %v1006_v44 = vld [vmem:[#allocation7 + $0x8] sm:$0xff] }
  0xd1   : > { %1623 = vmatprep.subr.mxu1 %v1962_v0 }
  0xd2   : > { %1624 = vmatpush3.msra.mxu1 %v329_v45 }
  0xd3   : > { %1625 = vmatprep.subr.mxu1 %v1962_v0 }
  0xd4   : > { %1626 = vmatpush3.msra.mxu1 %v328_v46  ;;  %v1005_v46 = vld [vmem:[#allocation7] sm:$0xff] }
  0xd5   : > { %1627 = vmatprep.subr.mxu1 %v1962_v0 }
  0xd6   : > { %1628 = vmatpush3.msra.mxu1 %v327_v47 }
  0xd7   : > { %1629 = vmatprep.subr.mxu1 %v1962_v0 }
  0xd8   : > { %1630 = vmatpush3.msra.mxu1 %v326_v48 }
  0xd9   : > { %1631 = vmatprep.subr.mxu1 %v1962_v0 }
  0xda   : > { %1632 = vmatpush3.msra.mxu1 %v325_v49 }
  0xdb   : > { %1633 = vmatprep.subr.mxu1 %v1962_v0 }
  0xdc   : > { %1634 = vmatpush3.msra.mxu1 %v324_v50 }
  0xdd   : > { %1635 = vmatprep.subr.mxu1 %v1962_v0 }
  0xde   : > { %1636 = vmatpush3.msra.mxu1 %v323_v51 }
  0xdf   : > { %1638 = vmatmul.mubr.f32.vlgmr.msra.gmra.mxu1 %v2210_v33  ;;  %1675 = vmatprep.subr.mxu1 %v1962_v0 }
  0xe0   : > { %1676 = vmatpush3.msra.mxu1 %v370_v52  ;;  %1707 = vmatprep.mubr.msk.f32.mxu1 %vm1963_vm0, %v1962_v0 }
  0xe1   : > { %1677 = vmatprep.subr.mxu1 %v1962_v0 }
  0xe2   : > { %1678 = vmatpush3.msra.mxu1 %v369_v53 }
  0xe3   : > { %1679 = vmatprep.subr.mxu1 %v1962_v0 }
  0xe4   : > { %1680 = vmatpush3.msra.mxu1 %v368_v54 }
  0xe5   : > { %1681 = vmatprep.subr.mxu1 %v1962_v0 }
  0xe6   : > { %1682 = vmatpush3.msra.mxu1 %v367_v55 }
  0xe7   : > { %1683 = vmatprep.subr.mxu1 %v1962_v0 }
  0xe8   : > { %1684 = vmatpush3.msra.mxu1 %v366_v56 }
  0xe9   : > { %1685 = vmatprep.subr.mxu1 %v1962_v0 }
  0xea   : > { %1686 = vmatpush3.msra.mxu1 %v365_v57 }
  0xeb   : > { %1687 = vmatprep.subr.mxu1 %v1962_v0 }
  0xec   : > { %1688 = vmatpush3.msra.mxu1 %v364_v58 }
  0xed   : > { %1689 = vmatprep.subr.mxu1 %v1962_v0 }
  0xee   : > { %1690 = vmatpush3.msra.mxu1 %v363_v59 }
  0xef   : > { %1691 = vmatprep.subr.mxu1 %v1962_v0 }
  0xf0   : > { %1692 = vmatpush3.msra.mxu1 %v362_v60 }
  0xf1   : > { %1693 = vmatprep.subr.mxu1 %v1962_v0 }
  0xf2   : > { %1694 = vmatpush3.msra.mxu1 %v361_v61 }
  0xf3   : > { %1695 = vmatprep.subr.mxu1 %v1962_v0 }
  0xf4   : > { %1696 = vmatpush3.msra.mxu1 %v360_v62 }
  0xf5   : > { %1697 = vmatprep.subr.mxu1 %v1962_v0 }
  0xf6   : > { %1698 = vmatpush3.msra.mxu1 %v359_v63 }
  0xf7   : > { %1699 = vmatprep.subr.mxu1 %v1962_v0 }
  0xf8   : > { %1700 = vmatpush3.msra.mxu1 %v358_v1  ;;  %v992_v1 = vlaneseq }
  0xf9   : > { %1701 = vmatprep.subr.mxu1 %v1962_v0 }
  0xfa   : > { %1702 = vmatpush3.msra.mxu1 %v357_v2  ;;  %v993_v2 = vshrl.u32 %v992_v1, 7 }
  0xfb   : > { %1703 = vmatprep.subr.mxu1 %v1962_v0 }
  0xfc   : > { %1704 = vmatpush3.msra.mxu1 %v356_v3  ;;  %v989_v3 = vld [vmem:[%s2548_s2] sm:$0x1] }
  0xfd   : > { %1705 = vmatprep.subr.mxu1 %v1962_v0 }
  0xfe   : > { %1706 = vmatpush3.msra.mxu1 %v355_v4  ;;  %v990_v4 = vadd.f32 1.0, %v989_v3 }
  0xff   : > { %1708 = vmatmul.mubr.f32.vlgmr.msra.gmra.mxu1 %v2210_v33  ;;  %v1032_v33 = vld [vmem:[#allocation7 + $0xd8] sm:$0xff] }
 0x100   : > { %1041 = vmatprep.subr.mxu0 %v1032_v33 }
 0x101   : > { %1042 = vmatpush1.msra.mxu0 %v1031_v15 }
 0x102   : > { %1043 = vmatprep.subr.mxu0 %v1030_v16 }
 0x103   : > { %1044 = vmatpush1.msra.mxu0 %v1029_v17 }
 0x104   : > { %1045 = vmatprep.subr.mxu0 %v1028_v18 }
 0x105   : > { %1046 = vmatpush1.msra.mxu0 %v1027_v19 }
 0x106   : > { %1047 = vmatprep.subr.mxu0 %v1026_v20 }
 0x107   : > { %1048 = vmatpush1.msra.mxu0 %v1025_v21 }
 0x108   : > { %1049 = vmatprep.subr.mxu0 %v1024_v22 }
 0x109   : > { %1050 = vmatpush1.msra.mxu0 %v1023_v23 }
 0x10a   : > { %1051 = vmatprep.subr.mxu0 %v1022_v24 }
 0x10b   : > { %1052 = vmatpush1.msra.mxu0 %v1021_v25 }
 0x10c   : > { %1053 = vmatprep.subr.mxu0 %v1020_v26 }
 0x10d   : > { %1054 = vmatpush1.msra.mxu0 %v1019_v27 }
 0x10e   : > { %1055 = vmatprep.subr.mxu0 %v1018_v28 }
 0x10f   : > { %1056 = vmatpush1.msra.mxu0 %v1017_v29 }
 0x110   : > { %1057 = vmatprep.subr.mxu0 %v1016_v30 }
 0x111   : > { %1058 = vmatpush1.msra.mxu0 %v1015_v31 }
 0x112   : > { %1059 = vmatprep.subr.mxu0 %v1014_v32 }
 0x113   : > { %1060 = vmatpush1.msra.mxu0 %v1013_v34 }
 0x114   : > { %1061 = vmatprep.subr.mxu0 %v1012_v35 }
 0x115   : > { %1062 = vmatpush1.msra.mxu0 %v1011_v36 }
 0x116   : > { %1063 = vmatprep.subr.mxu0 %v1010_v37 }
 0x117   : > { %1064 = vmatpush1.msra.mxu0 %v1009_v38 }
 0x118   : > { %1065 = vmatprep.subr.mxu0 %v1008_v40 }
 0x119   : > { %1066 = vmatpush1.msra.mxu0 %v1007_v42 }
 0x11a   : > { %1067 = vmatprep.subr.mxu0 %v1006_v44 }
 0x11b   : > { %1068 = vmatpush1.msra.mxu0 %v1005_v46 }
 0x13b   : > { %v2427_v5 = vpop.f32.mrf.mxu1 }
 0x13c   : > { %v2429_v6 = vpop.f32.mrf.mxu0  ;;  %v932_v7 = vmul.f32 %v2427_v5, %v2427_v5 }
 0x13d   : > { %v1464_v8 = vpop.f32.mrf.mxu1  ;;  %v934_v9 = vmul.f32 %v2429_v6, %v2429_v6 }
 0x13e   : > { %940 = vadd.xlane.f32.xlu0 %v932_v7  ;;  %v1534_v10 = vpop.f32.mrf.mxu0  ;;  %v994_v7 = vsub.s32 0, %v993_v2 }
 0x13f   : > { %944 = vadd.xlane.f32.xlu1 %v934_v9 }
 0x140   : > { %v2454_v8 = vrot.slane %v990_v4, %v994_v7 }
 0x15c   : > { %v508_v39 = vpop.f32.mrf.mxu1 }
 0x15d   : > { %v933_v41 = vmul.f32 %v508_v39, %v508_v39 }
 0x15e   : > { %v1499_v43 = vpop.f32.mrf.mxu1 }
 0x15f   : > { %942 = vadd.xlane.f32.xlu0 %v933_v41  ;;  %v2435_v45 = vpop.f32.mrf.mxu0 }
 0x160   : > { %v936_v47 = vmul.f32 %v2435_v45, %v2435_v45 }
 0x161   : > { %v1604_v48 = vpop.f32.mrf.mxu0 }
 0x163   : > { %948 = vadd.xlane.f32.xlu0 %v936_v47 }
 0x17f   : > { %v648_v49 = vpop.f32.mrf.mxu1 }
 0x180   : > { %v2439_v50 = vpop.f32.mrf.mxu0  ;;  %v935_v51 = vmul.f32 %v648_v49, %v648_v49 }
 0x181   : > { %v1569_v52 = vpop.f32.mrf.mxu1  ;;  %v938_v53 = vmul.f32 %v2439_v50, %v2439_v50 }
 0x182   : > { %946 = vadd.xlane.f32.xlu1 %v935_v51  ;;  %v1674_v54 = vpop.f32.mrf.mxu0 }
 0x183   : > { %952 = vadd.xlane.f32.xlu0 %v938_v53 }
 0x19f   : > { %v2443_v55 = vpop.f32.mrf.mxu1 }
 0x1a0   : > { %v937_v56 = vmul.f32 %v2443_v55, %v2443_v55 }
 0x1a1   : > { %v1639_v57 = vpop.f32.mrf.mxu1 }
 0x1a2   : > { %950 = vadd.xlane.f32.xlu1 %v937_v56 }
 0x1bf   : > { %v2447_v58 = vpop.f32.mrf.mxu1 }
 0x1c0   : > { %v939_v59 = vmul.f32 %v2447_v58, %v2447_v58 }
 0x1c1   : > { %v1709_v60 = vpop.f32.mrf.mxu1 }
 0x1c2   : > { %954 = vadd.xlane.f32.xlu1 %v939_v59 }
 0x1c7   : > { %v941_v61 = vpop.xlane.xlu0 %940 }
 0x1c8   : > { %v957_v62 = vmul.f32 0.0078125, %v941_v61  ;;  %v945_v12 = vpop.xlane.xlu1 %944 }
 0x1c9   : > { %v959_v13 = vmul.f32 0.0078125, %v945_v12 }
 0x1ca   : > { %v965_v63 = vadd.f32 1e-06, %v957_v62 }
 0x1cb   : > { %v967_v14 = vadd.f32 1e-06, %v959_v13 }
 0x1cc   : > { %1785 = vrsqrt.f32 %v965_v63 }
 0x1cd   : > { %1787 = vrsqrt.f32 %v967_v14 }
 0x1d9   : > { %v1786_v9 = vpop.eup %1785 }
 0x1da   : > { %v981_v10 = vmul.f32 %v1786_v9, %v2427_v5  ;;  %v1788_v17 = vpop.eup %1787 }
 0x1db   : > { %v983_v5 = vmul.f32 %v1788_v17, %v2429_v6 }
 0x1dc   : > { %v997_v11 = vmul.f32 %v2454_v8, %v981_v10 }
 0x1dd   : > { %v999_v21 = vmul.f32 %v2454_v8, %v983_v5 }
 0x1de   : > { %1102 = vmatmul.mubr.f32.vlgmr.msra.gmra.mxu0 %v997_v11 }
 0x1df   : > { %1107 = vmatprep.mubr.f32.mxu0 %v1962_v0 }
 0x1e8   : > { %v943_v33 = vpop.xlane.xlu0 %942 }
 0x1e9   : > { %v958_v15 = vmul.f32 0.0078125, %v943_v33 }
 0x1eb   : > { %v966_v16 = vadd.f32 1e-06, %v958_v15 }
 0x1ec   : > { %v949_v22 = vpop.xlane.xlu0 %948 }
 0x1ed   : > { %1789 = vrsqrt.f32 %v966_v16  ;;  %v961_v23 = vmul.f32 0.0078125, %v949_v22 }
 0x1ef   : > { %v969_v24 = vadd.f32 1e-06, %v961_v23 }
 0x1f1   : > { %1791 = vrsqrt.f32 %v969_v24 }
 0x1fa   : > { %v1790_v18 = vpop.eup %1789 }
 0x1fb   : > { %v982_v19 = vmul.f32 %v1790_v18, %v508_v39 }
 0x1fd   : > { %v998_v20 = vmul.f32 %v2454_v8, %v982_v19 }
 0x1fe   : > { %v1792_v28 = vpop.eup %1791 }
 0x1ff   : > { %1108 = vmatmul.mubr.f32.gmra.mxu0 %v998_v20  ;;  %v985_v31 = vmul.f32 %v1792_v28, %v2435_v45 }
 0x200   : > { %1113 = vmatprep.mubr.f32.mxu0 %v1962_v0 }
 0x201   : > { %v1001_v34 = vmul.f32 %v2454_v8, %v985_v31 }
 0x203   : > { %1114 = vmatmul.mubr.f32.gmra.mxu0 %v999_v21 }
 0x204   : > { %1119 = vmatprep.mubr.f32.mxu0 %v1962_v0 }
 0x20b   : > { %v947_v25 = vpop.xlane.xlu1 %946 }
 0x20c   : > { %v960_v26 = vmul.f32 0.0078125, %v947_v25  ;;  %v953_v32 = vpop.xlane.xlu0 %952 }
 0x20d   : > { %v963_v35 = vmul.f32 0.0078125, %v953_v32 }
 0x20e   : > { %v968_v27 = vadd.f32 1e-06, %v960_v26 }
 0x20f   : > { %v971_v36 = vadd.f32 1e-06, %v963_v35 }
 0x210   : > { %1793 = vrsqrt.f32 %v968_v27 }
 0x211   : > { %1795 = vrsqrt.f32 %v971_v36 }
 0x21d   : > { %v1794_v29 = vpop.eup %1793 }
 0x21e   : > { %v984_v30 = vmul.f32 %v1794_v29, %v648_v49  ;;  %v1796_v40 = vpop.eup %1795 }
 0x21f   : > { %v987_v44 = vmul.f32 %v1796_v40, %v2439_v50 }
 0x220   : > { %v1000_v6 = vmul.f32 %v2454_v8, %v984_v30 }
 0x221   : > { %v1003_v45 = vmul.f32 %v2454_v8, %v987_v44 }
 0x222   : > { %1120 = vmatmul.mubr.f32.gmra.mxu0 %v1000_v6 }
 0x223   : > { %1125 = vmatprep.mubr.f32.mxu0 %v1962_v0 }
 0x226   : > { %1126 = vmatmul.mubr.f32.gmra.mxu0 %v1001_v34 }
 0x227   : > { %1131 = vmatprep.mubr.f32.mxu0 %v1962_v0 }
 0x22b   : > { %v951_v37 = vpop.xlane.xlu1 %950 }
 0x22c   : > { %v962_v38 = vmul.f32 0.0078125, %v951_v37 }
 0x22e   : > { %v970_v39 = vadd.f32 1e-06, %v962_v38 }
 0x230   : > { %1797 = vrsqrt.f32 %v970_v39 }
 0x23d   : > { %v1798_v41 = vpop.eup %1797 }
 0x23e   : > { %v986_v42 = vmul.f32 %v1798_v41, %v2443_v55 }
 0x240   : > { %v1002_v43 = vmul.f32 %v2454_v8, %v986_v42 }
 0x242   : > { %1132 = vmatmul.mubr.f32.gmra.mxu0 %v1002_v43 }
 0x243   : > { %1137 = vmatprep.mubr.f32.mxu0 %v1962_v0 }
 0x246   : > { %1138 = vmatmul.mubr.f32.gmra.mxu0 %v1003_v45 }
 0x247   : > { %1143 = vmatprep.mubr.f32.mxu0 %v1962_v0 }
 0x24b   : > { %v955_v46 = vpop.xlane.xlu1 %954 }
 0x24c   : > { %v964_v47 = vmul.f32 0.0078125, %v955_v46 }
 0x24e   : > { %v972_v48 = vadd.f32 1e-06, %v964_v47 }
 0x250   : > { %1799 = vrsqrt.f32 %v972_v48 }
 0x25d   : > { %v1800_v49 = vpop.eup %1799 }
 0x25e   : > { %v988_v51 = vmul.f32 %v1800_v49, %v2447_v58 }
 0x260   : > { %v1004_v52 = vmul.f32 %v2454_v8, %v988_v51 }
 0x262   : > { %1144 = vmatmul.mubr.f32.gmra.mxu0 %v1004_v52 }
 0x29e   : > { %v1103_v50 = vpop.f32.mrf.mxu0 }
 0x29f   : > { %1150 = vst [vmem:[%s2478_s12] sm:$0xff] %v1103_v50 }
 0x2a0   : > { %v1105_v0 = vpop.f32.mrf.mxu0 }
 0x2a1   : > { %1151 = vst [vmem:[%s2478_s12 + $0x8] sm:$0xff] %v1105_v0 }
 0x2bf   : > { %v1109_v53 = vpop.f32.mrf.mxu0 }
 0x2c0   : > { %1152 = vst [vmem:[%s2478_s12 + $0x10] sm:$0xff] %v1109_v53 }
 0x2c1   : > { %v1111_v54 = vpop.f32.mrf.mxu0 }
 0x2c2   : > { %1153 = vst [vmem:[%s2478_s12 + $0x18] sm:$0xff] %v1111_v54 }
 0x2c3   : > { %v1115_v55 = vpop.f32.mrf.mxu0 }
 0x2c4   : > { %1154 = vst [vmem:[%s2478_s12 + $0x20] sm:$0xff] %v1115_v55 }
 0x2c5   : > { %v1117_v56 = vpop.f32.mrf.mxu0 }
 0x2c6   : > { %1155 = vst [vmem:[%s2478_s12 + $0x28] sm:$0xff] %v1117_v56 }
 0x2e2   : > { %v1121_v57 = vpop.f32.mrf.mxu0 }
 0x2e3   : > { %1156 = vst [vmem:[%s2478_s12 + $0x30] sm:$0xff] %v1121_v57 }
 0x2e4   : > { %v1123_v58 = vpop.f32.mrf.mxu0 }
 0x2e5   : > { %1157 = vst [vmem:[%s2478_s12 + $0x38] sm:$0xff] %v1123_v58 }
 0x2e6   : > { %v1127_v59 = vpop.f32.mrf.mxu0 }
 0x2e7   : > { %1158 = vst [vmem:[%s2478_s12 + $0x40] sm:$0xff] %v1127_v59 }
 0x2e8   : > { %v1129_v60 = vpop.f32.mrf.mxu0 }
 0x2e9   : > { %1159 = vst [vmem:[%s2478_s12 + $0x48] sm:$0xff] %v1129_v60 }
 0x302   : > { %v1133_v61 = vpop.f32.mrf.mxu0 }
 0x303   : > { %1160 = vst [vmem:[%s2478_s12 + $0x50] sm:$0xff] %v1133_v61 }
 0x304   : > { %v1135_v62 = vpop.f32.mrf.mxu0 }
 0x305   : > { %1161 = vst [vmem:[%s2478_s12 + $0x58] sm:$0xff] %v1135_v62 }
 0x306   : > { %v1139_v63 = vpop.f32.mrf.mxu0 }
 0x307   : > { %1162 = vst [vmem:[%s2478_s12 + $0x60] sm:$0xff] %v1139_v63 }
 0x308   : > { %v1141_v1 = vpop.f32.mrf.mxu0 }
 0x309   : > { %1163 = vst [vmem:[%s2478_s12 + $0x68] sm:$0xff] %v1141_v1 }
 0x322   : > { %v1145_v2 = vpop.f32.mrf.mxu0 }
 0x323   : > { %1164 = vst [vmem:[%s2478_s12 + $0x70] sm:$0xff] %v1145_v2 }
 0x324   : > { %v1147_v3 = vpop.f32.mrf.mxu0 }
 0x325   : > { %1165 = vst [vmem:[%s2478_s12 + $0x78] sm:$0xff] %v1147_v3 }
 0x326   : > { %1894 = shalt.err (!%p1891_p0)
}
 0x327   : > { %s1895_s23 = scalar_lea.hbm %s2499_s9, 2048  ;;  %s1899_s26 = scalar_lea.hbm %s2550_s4, 4096 }
 0x328   : > { %p1896_p2 = scmp.ne.s32.totalorder %s2499_s9, %s1895_s23  ;;  %p1900_p6 = scmp.lt.s32.totalorder %s2499_s9, %s2550_s4 }
 0x329   : > { %p1901_p13 = scmp.lt.s32.totalorder %s1899_s26, %s1895_s23 }
 0x32a   : > { %p1897_p3 = pnand %p1896_p2, %p2568_p11 }
 0x32b   : > { %p1902_p8 = por %p1901_p13, %p1900_p6 }
 0x32c   : > { %p1898_p7 = pneg %p1897_p3 }
 0x32e   : > { %p1903_p4 = pnand %p1902_p8, %p1898_p7 }
 0x330   : > { %1906 = shalt.err (!%p1903_p4)
}
 0x331   : > { %s1965_s12 = smov 256   ;;  %s1966_s13 = smov 16  }
 0x332   : > { %1720 = dma.vmem_to_hbm [thread:$0]  (%p2568_p11), %s2501_s7, 2048, %s2499_s9, %s1167_s10, %s1965_s12, %s1965_s12, %s1966_s13  }
 0x333 PF: > { %s1195_s25 = sand.u32 1, %s1941_s15   ;;  %p2569_p12 = scmp.ne.s32.totalorder %s2558_s28, 0 }
 0x334   : > { %p2570_p9 = scmp.ge.s32.totalorder %s1953_s18, 2  ;;  %s1196_s5 = scalar_lea.sflag [#allocation4], %s1195_s25 }
 0x336   : > { %p1734_p10 = pnand %p2570_p9, %p2569_p12 }
 0x338   : > { %p1735_p1 = pneg %p1734_p10 }
 0x33a   : > { %1936 = dma.done.wait (%p1735_p1), %s1196_s5, 2048  }
 0x33b   : > { %1938 = vsyncadd (%p1735_p1), %s1196_s5, 4294965248  ;;  %p18_p5 = scmp.ge.s32.totalorder %s2017_s21, 4   ;;  %s2571_s15 = smov %s1945_s16 }
 0x33c   : > { %s2572_s16 = smov %s1949_s17  ;;  %s2573_s17 = smov %s2029_s24 }
 0x33d   : > { %s2574_s18 = smov %s2017_s21  ;;  %20 = sbr.rel (!%p18_p5) target bundleno = 6 (0x6), region = 90 }
 0x342   :  { %1201 = vsyncpa [#allocation3], 1 }
 0x343   :  { %1203 = vsyncpa [#allocation3 + $0x1], 1 }
 0x344   :  { %1204 = vsyncpa [#allocation6], 1 }
 0x345   :  { %1206 = vsyncpa [#allocation6 + $0x1], 1 }
 0x346   :  { %1207 = vsyncpa [#allocation4], 1 }
 0x347   :  { %1209 = vsyncpa [#allocation4 + $0x1], 1 }

</bundles_post_ra>
